<compile_context>
chip_gen: v7x
topology: tpu7x:2x2x1
jax: 0.10.0
libtpu: 0.0.40
codegen_flags: <defaults>
</compile_context>

<pallas_src>
import functools

import jax
import jax.numpy as jnp
from jax.experimental import pallas as pl
from jax.experimental.pallas import tpu as pltpu

LANE = 128
SUBLANE = 8
SMALL_K_MAX = 8  # layers with in_features <= this skip the MXU (VPU broadcast-FMA path)


def _mlp_kernel(*refs, num_layers: int):
    """Fused MLP: Linear -> Tanh -> ... -> Linear (no Tanh on the last layer).

    refs = (x_ref, w0_ref, b0_ref, ..., w{L-1}_ref, b{L-1}_ref, o_ref)
    Hidden activations never leave VMEM/vregs; only the batch tile of x and the
    lane-dense (128-padded) output tile move HBM<->VMEM per grid step.
    """
    x_ref = refs[0]
    o_ref = refs[-1]
    wb = refs[1:-1]

    h = x_ref[...].astype(jnp.float32)
    for i in range(num_layers):
        w_ref = wb[2 * i]
        b = wb[2 * i + 1][...].astype(jnp.float32)
        d_in, d_out = w_ref.shape
        if d_in <= SMALL_K_MAX:
            # K is tiny: a (tm, K) @ (K, N) dot would light up only K of the
            # MXU's 128/256 systolic rows.  Do it as K broadcast FMAs on the
            # (otherwise idle) VPU instead — all in f32.
            w = w_ref[...].astype(jnp.float32)
            y = jnp.zeros((h.shape[0], d_out), jnp.float32)
            for k in range(d_in):
                y = y + h[:, k:k + 1] * w[k:k + 1, :]
            h = y + b
        else:
            # MXU path: bf16 operands (weights already stored bf16), f32 accumulation.
            h = jnp.dot(h.astype(w_ref.dtype), w_ref[...],
                        preferred_element_type=jnp.float32) + b
        if i != num_layers - 1:
            h = jnp.tanh(h)  # EUP slot, f32 (v5e has no bf16 EUP)
    o_ref[...] = h.astype(o_ref.dtype)


def prepare_params(params, matmul_dtype=jnp.bfloat16):
    """One-time prep (do NOT call per forward):
      * pad the final layer to a lane-dense (multiple-of-128) output width,
      * reshape biases to (1, d_out) and keep them f32,
      * cast MXU-path weights (in_features > SMALL_K_MAX) to `matmul_dtype`.
    Returns (prepared_params, dout_last)."""
    num_layers = len(params)
    dout_last = params[-1][0].shape[1]
    dout_pad = max(LANE, pl.cdiv(dout_last, LANE) * LANE)
    prepared = []
    for li, (w, b) in enumerate(params):
        w = jnp.asarray(w, jnp.float32)
        b = jnp.asarray(b, jnp.float32)
        d_in, d_out = w.shape
        if li == num_layers - 1 and d_out != dout_pad:
            # extra columns are zeros and get sliced off in the wrapper; keeps
            # the output store unmasked (lane-dense).
            w = jnp.pad(w, ((0, 0), (0, dout_pad - d_out)))
            b = jnp.pad(b, (0, dout_pad - d_out))
            d_out = dout_pad
        if d_in > SMALL_K_MAX:
            w = w.astype(matmul_dtype)  # MXU fast path; halves weight HBM/VMEM bytes
        prepared.append((w, b.reshape(1, d_out)))
    return prepared, dout_last


def mlp_forward(prepared_params, dout_last, x, *, block_batch: int = 256,
                use_core_parallel: bool = False, min_steps_for_core_parallel: int = 8):
    """Run the whole MLP in one fused Pallas kernel, tiled only over the batch axis.

    `prepared_params` must come from prepare_params (final layer already padded
    to a lane-dense width; biases shaped (1, d_out))."""
    batch, din = x.shape
    num_layers = len(prepared_params)
    dout_pad = prepared_params[-1][0].shape[1]

    # batch tile: multiple of 8 sublanes, capped at block_batch; pad batch to fit.
    # block_batch >= 256 => batch <= 256 runs in a single grid step.  For very
    # large PINN batches sweep {256, 512, 1024} (watch vreg spills above 256).
    tm = min(block_batch, max(SUBLANE, pl.cdiv(batch, SUBLANE) * SUBLANE))
    batch_pad = pl.cdiv(batch, tm) * tm
    xp = x if batch_pad == batch else jnp.pad(x, ((0, batch_pad - batch), (0, 0)))

    inputs = [xp]
    in_specs = [pl.BlockSpec((tm, din), lambda i: (i, 0))]

    flops = 0
    transcendentals = 0
    block_bytes = tm * din * xp.dtype.itemsize          # x tile (per buffer)
    bytes_accessed = xp.size * xp.dtype.itemsize

    for li, (w, b2) in enumerate(prepared_params):
        d_in, d_out = w.shape
        inputs += [w, b2]
        # whole-array blocks + constant index_map -> weights stay VMEM-resident
        # across all batch-grid steps.
        # TODO(synk): for large resident-weight MLPs on v7x (64 MiB VMEM), add
        # pipeline_mode=pl.Buffered(1) on these never-changing weight blocks to
        # avoid paying 2x their size for double-buffering.
        in_specs += [
            pl.BlockSpec(w.shape, lambda i: (0, 0)),
            pl.BlockSpec(b2.shape, lambda i: (0, 0)),
        ]
        flops += 2 * batch_pad * d_in * d_out
        if li != num_layers - 1:
            transcendentals += batch_pad * d_out
        wb_bytes = w.size * w.dtype.itemsize + b2.size * b2.dtype.itemsize
        block_bytes += wb_bytes
        bytes_accessed += wb_bytes
    block_bytes += tm * dout_pad * x.dtype.itemsize      # output tile (per buffer)
    bytes_accessed += batch_pad * dout_pad * x.dtype.itemsize

    grid_steps = batch_pad // tm
    # Plain "parallel" vs "arbitrary" doesn't change codegen; only CORE_PARALLEL
    # actually splits the grid across v7x's two TensorCores.  Only worth it when
    # each core gets several steps (otherwise it strips pipelining and just
    # duplicates the weight DMAs), so gate it on the number of grid steps.
    if use_core_parallel and grid_steps >= min_steps_for_core_parallel:
        dim_sem = (pltpu.CORE_PARALLEL,)
    else:
        dim_sem = ("parallel",)

    # Every input/output block is double-buffered by default; size the scoped
    # VMEM limit from the actual footprint (+ headroom) instead of relying on
    # the 16/32 MiB generation-dependent default.
    vmem_limit = int(max(2 * block_bytes + (4 << 20), 32 << 20))

    out = pl.pallas_call(
        functools.partial(_mlp_kernel, num_layers=num_layers),
        out_shape=jax.ShapeDtypeStruct((batch_pad, dout_pad), x.dtype),
        grid=(grid_steps,),
        in_specs=in_specs,
        out_specs=pl.BlockSpec((tm, dout_pad), lambda i: (i, 0)),
        compiler_params=pltpu.CompilerParams(
            dimension_semantics=dim_sem,
            vmem_limit_bytes=vmem_limit),
        cost_estimate=pl.CostEstimate(
            flops=int(flops),
            transcendentals=int(transcendentals),
            bytes_accessed=int(bytes_accessed)),
    )(*inputs)

    # NOTE: at very large batch the 128x-padded 1-column output becomes the
    # dominant HBM writeback; re-derive the regime before keeping the 128-wide
    # slab there.  At small batch it is the right trade (unmasked vst).
    return out[:batch, :dout_last]


def init_mlp_params(layers, key, dtype=jnp.float32):
    """Deterministic init matching nn.Linear's default U(-1/sqrt(fan_in), 1/sqrt(fan_in))."""
    params = []
    for i in range(len(layers) - 1):
        fan_in, fan_out = layers[i], layers[i + 1]
        key, wk, bk = jax.random.split(key, 3)
        bound = 1.0 / (fan_in ** 0.5)
        # stored as [in, out] == torch weight.T
        w = jax.random.uniform(wk, (fan_in, fan_out), dtype, minval=-bound, maxval=bound)
        b = jax.random.uniform(bk, (fan_out,), dtype, minval=-bound, maxval=bound)
        params.append((w, b))
    return params


if __name__ == "__main__":
    # PINN-style config (heat equation: inputs (x, t) -> u).  Hidden widths that
    # are multiples of 128 would be nearly free in wall-clock if the model shape
    # is negotiable; the spec uses 32 so we keep it.
    layers = [2, 32, 32, 1]
    batch = 256

    key = jax.random.PRNGKey(0)
    key, xk = jax.random.split(key)
    x = jax.random.normal(xk, (batch, layers[0]), dtype=jnp.float32)

    params = init_mlp_params(layers, key)
    prepared, dout = prepare_params(params)     # one-time pad/cast (not per call)

    out = mlp_forward(prepared, dout, x)        # single grid step at batch=256
    out = jax.block_until_ready(out)

    # reference with matching precision (bf16 MXU operands, f32 accumulation;
    # small-K layer in f32 on both sides)
    ref = x.astype(jnp.float32)
    for i, (w, b) in enumerate(params):
        if w.shape[0] <= SMALL_K_MAX:
            ref = ref @ w + b
        else:
            ref = jnp.dot(ref.astype(jnp.bfloat16), w.astype(jnp.bfloat16),
                          preferred_element_type=jnp.float32) + b
        if i != len(params) - 1:
            ref = jnp.tanh(ref)

    assert out.shape == (batch, layers[-1])
    assert jnp.allclose(out, ref, atol=1e-4, rtol=1e-4), float(jnp.max(jnp.abs(out - ref)))

    print("KERNEL_OK")
</pallas_src>

<mosaic_0001>
module attributes {stable_mosaic.version = 11 : i64} {
  func.func @_mlp_kernel(%arg0: i32, %arg1: memref<256x2xf32, #tpu.memory_space<vmem>>, %arg2: memref<2x32xf32, #tpu.memory_space<vmem>>, %arg3: memref<1x32xf32, #tpu.memory_space<vmem>>, %arg4: memref<32x32xbf16, #tpu.memory_space<vmem>>, %arg5: memref<1x32xf32, #tpu.memory_space<vmem>>, %arg6: memref<32x128xbf16, #tpu.memory_space<vmem>>, %arg7: memref<1x128xf32, #tpu.memory_space<vmem>>, %arg8: memref<256x128xf32, #tpu.memory_space<vmem>>) attributes {dimension_semantics = [#tpu.dimension_semantics<parallel>], iteration_bounds = array<i64: 1>, scalar_prefetch = 0 : i64, scratch_operands = 0 : i64, tpu.core_type = #tpu.core_type<tc>, window_params = [{transform_indices = @transform_0, window_bounds = array<i64: 256, 2>}, {pipeline_mode = #tpu.pipeline_mode<synchronous>, transform_indices = @transform_1, window_bounds = array<i64: 2, 32>}, {pipeline_mode = #tpu.pipeline_mode<synchronous>, transform_indices = @transform_2, window_bounds = array<i64: 1, 32>}, {pipeline_mode = #tpu.pipeline_mode<synchronous>, transform_indices = @transform_3, window_bounds = array<i64: 32, 32>}, {pipeline_mode = #tpu.pipeline_mode<synchronous>, transform_indices = @transform_4, window_bounds = array<i64: 1, 32>}, {pipeline_mode = #tpu.pipeline_mode<synchronous>, transform_indices = @transform_5, window_bounds = array<i64: 32, 128>}, {pipeline_mode = #tpu.pipeline_mode<synchronous>, transform_indices = @transform_6, window_bounds = array<i64: 1, 128>}, {transform_indices = @transform_7, window_bounds = array<i64: 256, 128>}]} {
    %c0 = arith.constant 0 : index
    %c0_0 = arith.constant 0 : index
    %0 = vector.load %arg1[%c0, %c0_0] : memref<256x2xf32, #tpu.memory_space<vmem>>, vector<256x2xf32>
    %c0_1 = arith.constant 0 : index
    %c0_2 = arith.constant 0 : index
    %1 = vector.load %arg3[%c0_1, %c0_2] : memref<1x32xf32, #tpu.memory_space<vmem>>, vector<1x32xf32>
    %c0_3 = arith.constant 0 : index
    %c0_4 = arith.constant 0 : index
    %2 = vector.load %arg2[%c0_3, %c0_4] : memref<2x32xf32, #tpu.memory_space<vmem>>, vector<2x32xf32>
    %cst = arith.constant 0.000000e+00 : f32
    %3 = vector.broadcast %cst : f32 to vector<256x32xf32>
    %4 = vector.extract_strided_slice %0 {offsets = [0, 0], sizes = [256, 1], strides = [1, 1]} : vector<256x2xf32> to vector<256x1xf32>
    %5 = vector.extract_strided_slice %2 {offsets = [0, 0], sizes = [1, 32], strides = [1, 1]} : vector<2x32xf32> to vector<1x32xf32>
    %6 = vector.broadcast %4 : vector<256x1xf32> to vector<256x32xf32>
    %7 = vector.broadcast %5 : vector<1x32xf32> to vector<256x32xf32>
    %8 = arith.mulf %6, %7 : vector<256x32xf32>
    %9 = arith.addf %3, %8 : vector<256x32xf32>
    %10 = vector.extract_strided_slice %0 {offsets = [0, 1], sizes = [256, 1], strides = [1, 1]} : vector<256x2xf32> to vector<256x1xf32>
    %11 = vector.extract_strided_slice %2 {offsets = [1, 0], sizes = [1, 32], strides = [1, 1]} : vector<2x32xf32> to vector<1x32xf32>
    %12 = vector.broadcast %10 : vector<256x1xf32> to vector<256x32xf32>
    %13 = vector.broadcast %11 : vector<1x32xf32> to vector<256x32xf32>
    %14 = arith.mulf %12, %13 : vector<256x32xf32>
    %15 = arith.addf %9, %14 : vector<256x32xf32>
    %16 = vector.broadcast %1 : vector<1x32xf32> to vector<256x32xf32>
    %17 = arith.addf %15, %16 : vector<256x32xf32>
    %18 = math.tanh %17 : vector<256x32xf32>
    %c0_5 = arith.constant 0 : index
    %c0_6 = arith.constant 0 : index
    %19 = vector.load %arg5[%c0_5, %c0_6] : memref<1x32xf32, #tpu.memory_space<vmem>>, vector<1x32xf32>
    %20 = arith.truncf %18 : vector<256x32xf32> to vector<256x32xbf16>
    %c0_7 = arith.constant 0 : index
    %c0_8 = arith.constant 0 : index
    %21 = vector.load %arg4[%c0_7, %c0_8] : memref<32x32xbf16, #tpu.memory_space<vmem>>, vector<32x32xbf16>
    %cst_9 = arith.constant dense<0.000000e+00> : vector<256x32xf32>
    %22 = tpu.matmul %20, %21, %cst_9 {dimension_numbers = #tpu.dot_dimension_numbers<[1], [0], [0], [1], [0, 0, 1, 1], [], []>} : vector<256x32xbf16>, vector<32x32xbf16>, vector<256x32xf32> -> vector<256x32xf32>
    %23 = vector.broadcast %19 : vector<1x32xf32> to vector<256x32xf32>
    %24 = arith.addf %22, %23 : vector<256x32xf32>
    %25 = math.tanh %24 : vector<256x32xf32>
    %c0_10 = arith.constant 0 : index
    %c0_11 = arith.constant 0 : index
    %26 = vector.load %arg7[%c0_10, %c0_11] : memref<1x128xf32, #tpu.memory_space<vmem>>, vector<1x128xf32>
    %27 = arith.truncf %25 : vector<256x32xf32> to vector<256x32xbf16>
    %c0_12 = arith.constant 0 : index
    %c0_13 = arith.constant 0 : index
    %28 = vector.load %arg6[%c0_12, %c0_13] : memref<32x128xbf16, #tpu.memory_space<vmem>>, vector<32x128xbf16>
    %cst_14 = arith.constant dense<0.000000e+00> : vector<256x128xf32>
    %29 = tpu.matmul %27, %28, %cst_14 {dimension_numbers = #tpu.dot_dimension_numbers<[1], [0], [0], [1], [0, 0, 1, 1], [], []>} : vector<256x32xbf16>, vector<32x128xbf16>, vector<256x128xf32> -> vector<256x128xf32>
    %30 = vector.broadcast %26 : vector<1x128xf32> to vector<256x128xf32>
    %31 = arith.addf %29, %30 : vector<256x128xf32>
    %c0_15 = arith.constant 0 : index
    %c0_16 = arith.constant 0 : index
    %32 = vector.load %arg8[%c0_15, %c0_16] : memref<256x128xf32, #tpu.memory_space<vmem>>, vector<256x128xf32>
    tpu.vector_store %arg8[%c0_15, %c0_16], %31 {strides = array<i32>} : memref<256x128xf32, #tpu.memory_space<vmem>>, vector<256x128xf32>,
    return
  }
  func.func @transform_0(%arg0: i32) -> (i32, i32) {
    %c0_i32 = arith.constant 0 : i32
    %c0_i32_0 = arith.constant 0 : i32
    return %arg0, %c0_i32 : i32, i32
  }
  func.func @transform_1(%arg0: i32) -> (i32, i32) {
    %c0_i32 = arith.constant 0 : i32
    %c0_i32_0 = arith.constant 0 : i32
    %c0_i32_1 = arith.constant 0 : i32
    return %c0_i32, %c0_i32_0 : i32, i32
  }
  func.func @transform_2(%arg0: i32) -> (i32, i32) {
    %c0_i32 = arith.constant 0 : i32
    %c0_i32_0 = arith.constant 0 : i32
    %c0_i32_1 = arith.constant 0 : i32
    return %c0_i32, %c0_i32_0 : i32, i32
  }
  func.func @transform_3(%arg0: i32) -> (i32, i32) {
    %c0_i32 = arith.constant 0 : i32
    %c0_i32_0 = arith.constant 0 : i32
    %c0_i32_1 = arith.constant 0 : i32
    return %c0_i32, %c0_i32_0 : i32, i32
  }
  func.func @transform_4(%arg0: i32) -> (i32, i32) {
    %c0_i32 = arith.constant 0 : i32
    %c0_i32_0 = arith.constant 0 : i32
    %c0_i32_1 = arith.constant 0 : i32
    return %c0_i32, %c0_i32_0 : i32, i32
  }
  func.func @transform_5(%arg0: i32) -> (i32, i32) {
    %c0_i32 = arith.constant 0 : i32
    %c0_i32_0 = arith.constant 0 : i32
    %c0_i32_1 = arith.constant 0 : i32
    return %c0_i32, %c0_i32_0 : i32, i32
  }
  func.func @transform_6(%arg0: i32) -> (i32, i32) {
    %c0_i32 = arith.constant 0 : i32
    %c0_i32_0 = arith.constant 0 : i32
    %c0_i32_1 = arith.constant 0 : i32
    return %c0_i32, %c0_i32_0 : i32, i32
  }
  func.func @transform_7(%arg0: i32) -> (i32, i32) {
    %c0_i32 = arith.constant 0 : i32
    %c0_i32_0 = arith.constant 0 : i32
    return %arg0, %c0_i32 : i32, i32
  }
}

</mosaic_0001>

<bundles_post_ra>
// kernel: tpu_custom_call.1
= control target key start
LH: loop header
LB: loop body
LE: loop exit
PB: predicated region body
PF: predicated region fallthrough
CT: control target
= control target key end

     0   :  { %v1475_v2 = vmov 1   ;;  %v1476_v8 = vmov 0   ;;  %s1910_s0 = inlined_call_operand.vmem [shape: f32[256,2], index: 0, kind: input, shape index: {}]   ;;  %s1911_s1 = inlined_call_operand.vmem [shape: f32[2,32], index: 1, kind: input, shape index: {}]   ;;  %s1912_s2 = inlined_call_operand.vmem [shape: f32[1,32], index: 2, kind: input, shape index: {}]   ;;  %s1913_s3 = inlined_call_operand.vmem [shape: bf16[32,32], index: 3, kind: input, shape index: {}]   ;;  %s1914_s4 = inlined_call_operand.vmem [shape: f32[1,32], index: 4, kind: input, shape index: {}]   ;;  %s1915_s5 = inlined_call_operand.vmem [shape: bf16[32,128], index: 5, kind: input, shape index: {}]   ;;  %s1916_s6 = inlined_call_operand.vmem [shape: f32[1,128], index: 6, kind: input, shape index: {}]   ;;  %s1917_s7 = inlined_call_operand.hbm [shape: f32[256,128], index: 7, kind: output, shape index: {}]  }
   0x1   :  { %v30_v0 = vld [vmem:[%s1910_s0 + $0x10] sm:$0xff]  ;;  %v28_v1 = vld [vmem:[%s1910_s0] sm:$0xff]  ;;  %1287 = vset.pattern.permute.xlu0 %v1475_v2  ;;  %1285 = vset.pattern.permute.xlu1 %v1475_v2  ;;  %v29_v4 = vld [vmem:[%s1910_s0 + $0x8] sm:$0xff] }
   0x2   :  { %299 = vperm.xlu0 %1287, %v30_v0   ;;  %291 = vperm.xlu1 %1285, %v28_v1   ;;  %v34_v3 = vld [vmem:[%s1910_s0 + $0x30] sm:$0xff]  ;;  %v31_v6 = vld [vmem:[%s1910_s0 + $0x18] sm:$0xff] }
   0x3   :  { %v38_v5 = vld [vmem:[%s1910_s0 + $0x50] sm:$0xff] }
   0x4   :  { %v42_v7 = vld [vmem:[%s1910_s0 + $0x70] sm:$0xff] }
   0x6   :  { %315 = vperm.xlu0 %1287, %v34_v3   ;;  %295 = vperm.xlu1 %1285, %v29_v4  }
   0xa   :  { %331 = vperm.xlu0 %1287, %v38_v5   ;;  %1286 = vset.pattern.permute.xlu1 %v1476_v8 }
   0xb   :  { %79 = vperm.xlu1 %1286, %v31_v6  }
   0xc   :  { %12 = vsyncpa [#allocation3], 0  ;;  %v46_v9 = vld [vmem:[%s1910_s0 + $0x90] sm:$0xff]  ;;  %v32_v10 = vld [vmem:[%s1910_s0 + $0x20] sm:$0xff]  ;;  %v222_v40 = vlaneseq  ;;  %vm595_vm0 = vcmask 261120  }
   0xd   :  { %v50_v11 = vld [vmem:[%s1910_s0 + $0xb0] sm:$0xff]  ;;  %v33_v13 = vld [vmem:[%s1910_s0 + $0x28] sm:$0xff]  ;;  %v35_v14 = vld [vmem:[%s1910_s0 + $0x38] sm:$0xff] }
   0xe   :  { %347 = vperm.xlu0 %1287, %v42_v7   ;;  %v54_v12 = vld [vmem:[%s1910_s0 + $0xd0] sm:$0xff]  ;;  %v36_v15 = vld [vmem:[%s1910_s0 + $0x40] sm:$0xff]  ;;  %v37_v16 = vld [vmem:[%s1910_s0 + $0x48] sm:$0xff]  ;;  %v223_v43 = vshrl.u32 %v222_v40, 7 }
   0xf   :  { %1288 = vset.pattern.permute.xlu1 %v1475_v2  ;;  %v1319_v17 = vld [vmem:[%s1913_s3] sm:$0xff]   ;;  %v1320_v18 = vld [vmem:[%s1913_s3 + $0x8] sm:$0xff]   ;;  %v39_v20 = vld [vmem:[%s1910_s0 + $0x58] sm:$0xff] }
  0x10   :  { %303 = vperm.xlu1 %1288, %v31_v6   ;;  %1208 = vmatprep.subr.bf16.mxu0 %v1319_v17  ;;  %v41_v19 = vld [vmem:[%s1910_s0 + $0x68] sm:$0xff]  ;;  %v40_v22 = vld [vmem:[%s1910_s0 + $0x60] sm:$0xff]  ;;  %v43_v25 = vld [vmem:[%s1910_s0 + $0x78] sm:$0xff]  ;;  %v420_v46 = vsub.s32 1, %v223_v43  ;;  %v224_v49 = vsub.s32 0, %v223_v43 }
  0x11   :  { %1209 = vmatpush3.bf16.msra.mxu0 %v1319_v17  ;;  %v45_v21 = vld [vmem:[%s1910_s0 + $0x88] sm:$0xff]  ;;  %v44_v27 = vld [vmem:[%s1910_s0 + $0x80] sm:$0xff]  ;;  %v58_v28 = vld [vmem:[%s1910_s0 + $0xf0] sm:$0xff] }
  0x12   :  { %363 = vperm.xlu0 %1287, %v46_v9   ;;  %1210 = vmatprep.subr.bf16.mxu0 %v1320_v18  ;;  %v49_v23 = vld [vmem:[%s1910_s0 + $0xa8] sm:$0xff]  ;;  %v47_v29 = vld [vmem:[%s1910_s0 + $0x98] sm:$0xff]  ;;  %v48_v30 = vld [vmem:[%s1910_s0 + $0xa0] sm:$0xff] }
  0x13   :  { %v53_v24 = vld [vmem:[%s1910_s0 + $0xc8] sm:$0xff]  ;;  %v51_v31 = vld [vmem:[%s1910_s0 + $0xb8] sm:$0xff]  ;;  %v52_v38 = vld [vmem:[%s1910_s0 + $0xc0] sm:$0xff] }
  0x14   :  { %1289 = vset.pattern.permute.xlu1 %v1476_v8  ;;  %v1612_v26 = vld [vmem:[%s1910_s0 + $0xe8] sm:$0xff]  ;;  %v61_v47 = vld [vmem:[%s1911_s1] sm:$0x3]  ;;  %v55_v48 = vld [vmem:[%s1910_s0 + $0xd8] sm:$0xff] }
  0x15   :  { %84 = vperm.xlu1 %1289, %v32_v10   ;;  %1211 = vmatpush3.bf16.msra.mxu0 %v1320_v18  ;;  %v1663_v52 = vrot.slane %v61_v47, %v420_v46  ;;  %v1665_v53 = vrot.slane %v61_v47, %v224_v49  ;;  %v56_v63 = vld [vmem:[%s1910_s0 + $0xe0] sm:$0xff] }
  0x16   :  { %379 = vperm.xlu0 %1287, %v50_v11  }
  0x19   :  { %1290 = vset.pattern.permute.xlu1 %v1475_v2 }
  0x1a   :  { %395 = vperm.xlu0 %1287, %v54_v12   ;;  %307 = vperm.xlu1 %1290, %v32_v10  }
  0x1e   :  { %1312 = vset.pattern.permute.xlu0 %v1476_v8  ;;  %311 = vperm.xlu1 %1290, %v33_v13  }
  0x1f   :  { %64 = vperm.xlu0 %1312, %v28_v1   ;;  %v1679_v1 = vld [vmem:[%s1912_s2] ss:$0 sm:$0xff] }
  0x22   :  { %1291 = vset.pattern.permute.xlu1 %v1476_v8 }
  0x23   :  { %69 = vperm.xlu0 %1312, %v29_v4   ;;  %99 = vperm.xlu1 %1291, %v35_v14  }
  0x27   :  { %74 = vperm.xlu0 %1312, %v30_v0   ;;  %1292 = vset.pattern.permute.xlu1 %v1475_v2 }
  0x28   :  { %319 = vperm.xlu1 %1292, %v35_v14  }
  0x2b   :  { %89 = vperm.xlu0 %1312, %v33_v13  }
  0x2c   :  { %1293 = vset.pattern.permute.xlu1 %v1476_v8 }
  0x2d   :  { %104 = vperm.xlu1 %1293, %v36_v15  }
  0x2f   :  { %94 = vperm.xlu0 %1312, %v34_v3  }
  0x31   :  { %1294 = vset.pattern.permute.xlu1 %v1475_v2 }
  0x32   :  { %323 = vperm.xlu1 %1294, %v36_v15  }
  0x33   :  { %109 = vperm.xlu0 %1312, %v37_v16  }
  0x36   :  { %327 = vperm.xlu1 %1294, %v37_v16  }
  0x37   :  { %114 = vperm.xlu0 %1312, %v38_v5  }
  0x3a   :  { %1295 = vset.pattern.permute.xlu1 %v1476_v8 }
  0x3b   :  { %129 = vperm.xlu0 %1312, %v41_v19   ;;  %119 = vperm.xlu1 %1295, %v39_v20  }
  0x3f   :  { %134 = vperm.xlu0 %1312, %v42_v7   ;;  %1296 = vset.pattern.permute.xlu1 %v1475_v2 }
  0x40   :  { %335 = vperm.xlu1 %1296, %v39_v20  }
  0x43   :  { %149 = vperm.xlu0 %1312, %v45_v21  }
  0x44   :  { %1297 = vset.pattern.permute.xlu1 %v1476_v8 }
  0x45   :  { %124 = vperm.xlu1 %1297, %v40_v22  }
  0x47   :  { %154 = vperm.xlu0 %1312, %v46_v9  }
  0x49   :  { %1298 = vset.pattern.permute.xlu1 %v1475_v2 }
  0x4a   :  { %339 = vperm.xlu1 %1298, %v40_v22  }
  0x4b   :  { %169 = vperm.xlu0 %1312, %v49_v23  }
  0x4e   :  { %343 = vperm.xlu1 %1298, %v41_v19  }
  0x4f   :  { %174 = vperm.xlu0 %1312, %v50_v11  }
  0x52   :  { %1299 = vset.pattern.permute.xlu1 %v1476_v8 }
  0x53   :  { %189 = vperm.xlu0 %1312, %v53_v24   ;;  %139 = vperm.xlu1 %1299, %v43_v25  }
  0x57   :  { %194 = vperm.xlu0 %1312, %v54_v12   ;;  %1300 = vset.pattern.permute.xlu1 %v1475_v2 }
  0x58   :  { %351 = vperm.xlu1 %1300, %v43_v25  }
  0x5b   :  { %209 = vperm.xlu0 %1312, %v1612_v26  }
  0x5c   :  { %1301 = vset.pattern.permute.xlu1 %v1476_v8 }
  0x5d   :  { %144 = vperm.xlu1 %1301, %v44_v27  }
  0x5f   :  { %214 = vperm.xlu0 %1312, %v58_v28  }
  0x61   :  { %1302 = vset.pattern.permute.xlu1 %v1475_v2 }
  0x62   :  { %355 = vperm.xlu1 %1302, %v44_v27  }
  0x63   :  { %1317 = vset.pattern.permute.xlu0 %v1475_v2 }
  0x64   :  { %411 = vperm.xlu0 %1317, %v58_v28  }
  0x66   :  { %359 = vperm.xlu1 %1302, %v45_v21  }
  0x6a   :  { %1303 = vset.pattern.permute.xlu1 %v1476_v8 }
  0x6b   :  { %159 = vperm.xlu1 %1303, %v47_v29  }
  0x6f   :  { %1304 = vset.pattern.permute.xlu1 %v1475_v2 }
  0x70   :  { %367 = vperm.xlu1 %1304, %v47_v29  }
  0x74   :  { %1305 = vset.pattern.permute.xlu1 %v1476_v8 }
  0x75   :  { %164 = vperm.xlu1 %1305, %v48_v30  }
  0x79   :  { %1306 = vset.pattern.permute.xlu1 %v1475_v2 }
  0x7a   :  { %371 = vperm.xlu1 %1306, %v48_v30  }
  0x7e   :  { %375 = vperm.xlu1 %1306, %v49_v23  }
  0x81   :  { %v292_v32 = vpop.permute.xlu1 %291  ;;  %v300_v33 = vpop.permute.xlu0 %299 }
  0x82   :  { %1307 = vset.pattern.permute.xlu1 %v1476_v8  ;;  %v422_v56 = vmul.f32 %v1663_v52, %v292_v32  ;;  %v424_v7 = vmul.f32 %v1663_v52, %v300_v33 }
  0x83   :  { %179 = vperm.xlu1 %1307, %v51_v31  }
  0x85   :  { %v296_v34 = vpop.permute.xlu1 %295  ;;  %v1638_v35 = vpop.permute.xlu0 %315 }
  0x86   :  { %v423_v0 = vmul.f32 %v1663_v52, %v296_v34  ;;  %v428_v28 = vmul.f32 %v1663_v52, %v1638_v35  ;;  %v59_v34 = vld [vmem:[%s1910_s0 + $0xf8] sm:$0xff] }
  0x87   :  { %1308 = vset.pattern.permute.xlu1 %v1475_v2 }
  0x88   :  { %383 = vperm.xlu1 %1308, %v51_v31  }
  0x89   :  { %v1641_v36 = vpop.permute.xlu0 %331 }
  0x8a   :  { %v80_v37 = vpop.permute.xlu1 %79 }
  0x8b   :  { %v229_v60 = vmul.f32 %v1665_v53, %v80_v37 }
  0x8c   :  { %1309 = vset.pattern.permute.xlu1 %v1476_v8 }
  0x8d   :  { %184 = vperm.xlu1 %1309, %v52_v38   ;;  %v1647_v39 = vpop.permute.xlu0 %347 }
  0x8f   :  { %v304_v41 = vpop.permute.xlu1 %303 }
  0x90   :  { %v425_v58 = vmul.f32 %v1663_v52, %v304_v41 }
  0x91   :  { %1310 = vset.pattern.permute.xlu1 %v1475_v2  ;;  %v1650_v42 = vpop.permute.xlu0 %363 }
  0x92   :  { %387 = vperm.xlu1 %1310, %v52_v38   ;;  %v457_v4 = vadd.f32 %v425_v58, %v229_v60 }
  0x94   :  { %v85_v44 = vpop.permute.xlu1 %84  ;;  %v495_v15 = vadd.f32 %v1679_v1, %v457_v4 }
  0x95   :  { %v1652_v45 = vpop.permute.xlu0 %379  ;;  %v230_v10 = vmul.f32 %v1665_v53, %v85_v44 }
  0x96   :  { %391 = vperm.xlu1 %1310, %v53_v24  }
  0x99   :  { %v308_v50 = vpop.permute.xlu1 %307  ;;  %v1660_v51 = vpop.permute.xlu0 %395 }
  0x9a   :  { %1311 = vset.pattern.permute.xlu1 %v1476_v8  ;;  %v426_v5 = vmul.f32 %v1663_v52, %v308_v50 }
  0x9b   :  { %199 = vperm.xlu1 %1311, %v55_v48  }
  0x9c   :  { %v458_v16 = vadd.f32 %v426_v5, %v230_v10 }
  0x9d   :  { %v312_v54 = vpop.permute.xlu1 %311 }
  0x9e   :  { %v65_v55 = vpop.permute.xlu0 %64  ;;  %v427_v21 = vmul.f32 %v1663_v52, %v312_v54  ;;  %v496_v24 = vadd.f32 %v1679_v1, %v458_v16 }
  0x9f   :  { %v226_v57 = vmul.f32 %v1665_v53, %v65_v55  ;;  %1313 = vset.pattern.permute.xlu1 %v1475_v2 }
  0xa0   :  { %399 = vperm.xlu1 %1313, %v55_v48  }
  0xa1   :  { %v454_v59 = vadd.f32 %v422_v56, %v226_v57  ;;  %v432_v57 = vmul.f32 %v1663_v52, %v1641_v36 }
  0xa2   :  { %v70_v61 = vpop.permute.xlu0 %69  ;;  %v100_v62 = vpop.permute.xlu1 %99 }
  0xa3   :  { %v227_v3 = vmul.f32 %v1665_v53, %v70_v61  ;;  %v492_v6 = vadd.f32 %v1679_v1, %v454_v59  ;;  %v233_v19 = vmul.f32 %v1665_v53, %v100_v62 }
  0xa4   :  { %1314 = vset.pattern.permute.xlu1 %v1476_v8 }
  0xa5   :  { %v455_v9 = vadd.f32 %v423_v0, %v227_v3  ;;  %204 = vperm.xlu1 %1314, %v56_v63   ;;  %1323 = vtanh.f32 %v492_v6 }
  0xa6   :  { %v75_v11 = vpop.permute.xlu0 %74 }
  0xa7   :  { %v493_v12 = vadd.f32 %v1679_v1, %v455_v9  ;;  %v228_v13 = vmul.f32 %v1665_v53, %v75_v11  ;;  %v320_v14 = vpop.permute.xlu1 %319 }
  0xa8   :  { %v429_v17 = vmul.f32 %v1663_v52, %v320_v14 }
  0xa9   :  { %1325 = vtanh.f32 %v493_v12  ;;  %v456_v18 = vadd.f32 %v424_v7, %v228_v13  ;;  %1315 = vset.pattern.permute.xlu1 %v1475_v2 }
  0xaa   :  { %v90_v20 = vpop.permute.xlu0 %89  ;;  %403 = vperm.xlu1 %1315, %v56_v63   ;;  %1327 = vtanh.f32 %v495_v15  ;;  %v461_v25 = vadd.f32 %v429_v17, %v233_v19 }
  0xab   :  { %v494_v22 = vadd.f32 %v1679_v1, %v456_v18  ;;  %v231_v23 = vmul.f32 %v1665_v53, %v90_v20 }
  0xac   :  { %v105_v27 = vpop.permute.xlu1 %104  ;;  %v499_v33 = vadd.f32 %v1679_v1, %v461_v25 }
  0xad   :  { %1329 = vtanh.f32 %v494_v22  ;;  %v459_v29 = vadd.f32 %v427_v21, %v231_v23  ;;  %v234_v40 = vmul.f32 %v1665_v53, %v105_v27 }
  0xae   :  { %v95_v30 = vpop.permute.xlu0 %94  ;;  %407 = vperm.xlu1 %1315, %v1612_v26   ;;  %1331 = vtanh.f32 %v496_v24 }
  0xaf   :  { %v497_v31 = vadd.f32 %v1679_v1, %v459_v29  ;;  %v232_v32 = vmul.f32 %v1665_v53, %v95_v30  ;;  %v1324_v35 = vpop.eup %1323 }
  0xb1   :  { %1333 = vtanh.f32 %v497_v31  ;;  %v460_v37 = vadd.f32 %v428_v28, %v232_v32  ;;  %v324_v38 = vpop.permute.xlu1 %323  ;;  %v436_v31 = vmul.f32 %v1663_v52, %v1647_v39 }
  0xb2   :  { %v430_v41 = vmul.f32 %v1663_v52, %v324_v38  ;;  %v110_v26 = vpop.permute.xlu0 %109  ;;  %1316 = vset.pattern.permute.xlu1 %v1476_v8  ;;  %1335 = vtanh.f32 %v499_v33 }
  0xb3   :  { %v1326_v43 = vpop.eup %1325  ;;  %v498_v44 = vadd.f32 %v1679_v1, %v460_v37  ;;  %219 = vperm.xlu1 %1316, %v59_v34   ;;  %v235_v47 = vmul.f32 %v1665_v53, %v110_v26 }
  0xb4   :  { %v462_v46 = vadd.f32 %v430_v41, %v234_v40  ;;  %v557_v48 = vpack.c.bf16 %v1326_v43, %v1324_v35  ;;  %v1328_v50 = vpop.eup %1327 }
  0xb5   :  { %1337 = vtanh.f32 %v498_v44  ;;  %v328_v49 = vpop.permute.xlu1 %327 }
  0xb6   :  { %v431_v54 = vmul.f32 %v1663_v52, %v328_v49  ;;  %1212 = vmatprep.mubr.msk.bf16.mxu0 %vm595_vm0, %v557_v48  ;;  %v500_v8 = vadd.f32 %v1679_v1, %v462_v46  ;;  %v115_v56 = vpop.permute.xlu0 %114 }
  0xb7   :  { %v1330_v55 = vpop.eup %1329  ;;  %1318 = vset.pattern.permute.xlu1 %v1475_v2  ;;  %v236_v59 = vmul.f32 %v1665_v53, %v115_v56 }
  0xb8   :  { %v463_v58 = vadd.f32 %v431_v54, %v235_v47  ;;  %415 = vperm.xlu1 %1318, %v59_v34   ;;  %v558_v60 = vpack.c.bf16 %v1328_v50, %v1330_v55  ;;  %v1332_v61 = vpop.eup %1331  ;;  %1339 = vtanh.f32 %v500_v8 }
  0xb9   :  { %v464_v3 = vadd.f32 %v432_v57, %v236_v59 }
  0xba   :  { %v501_v62 = vadd.f32 %v1679_v1, %v463_v58  ;;  %1213 = vmatmul.mubr.msk.bf16.vlgmr.msra.gmra.mrb[0].mxu0 %vm595_vm0, %v558_v60  ;;  %v120_v63 = vpop.permute.xlu1 %119  ;;  %v130_v18 = vpop.permute.xlu0 %129 }
  0xbb   :  { %v1334_v0 = vpop.eup %1333  ;;  %v502_v6 = vadd.f32 %v1679_v1, %v464_v3  ;;  %v237_v7 = vmul.f32 %v1665_v53, %v120_v63  ;;  %v239_v21 = vmul.f32 %v1665_v53, %v130_v18 }
  0xbc   :  { %1341 = vtanh.f32 %v501_v62  ;;  %v559_v4 = vpack.c.bf16 %v1334_v0, %v1332_v61  ;;  %v1336_v2 = vpop.eup %1335  ;;  %v440_v0 = vmul.f32 %v1663_v52, %v1650_v42 }
  0xbd   :  { %1343 = vtanh.f32 %v502_v6 }
  0xbe   :  { %1216 = vmatprep.mubr.msk.bf16.mxu0 %vm595_vm0, %v559_v4  ;;  %v135_v29 = vpop.permute.xlu0 %134 }
  0xbf   :  { %v1338_v36 = vpop.eup %1337  ;;  %v336_v5 = vpop.permute.xlu1 %335  ;;  %v240_v32 = vmul.f32 %v1665_v53, %v135_v29 }
  0xc0   :  { %v433_v9 = vmul.f32 %v1663_v52, %v336_v5  ;;  %v560_v10 = vpack.c.bf16 %v1336_v2, %v1338_v36 }
  0xc1   :  { %v468_v38 = vadd.f32 %v436_v31, %v240_v32 }
  0xc2   :  { %v465_v11 = vadd.f32 %v433_v9, %v237_v7  ;;  %1217 = vmatmul.mubr.msk.bf16.gmra.mrb[4].mxu0 %vm595_vm0, %v560_v10  ;;  %v1340_v14 = vpop.eup %1339  ;;  %v150_v50 = vpop.permute.xlu0 %149 }
  0xc3   :  { %v506_v26 = vadd.f32 %v1679_v1, %v468_v38  ;;  %v243_v8 = vmul.f32 %v1665_v53, %v150_v50 }
  0xc4   :  { %v503_v12 = vadd.f32 %v1679_v1, %v465_v11  ;;  %v125_v13 = vpop.permute.xlu1 %124 }
  0xc5   :  { %v238_v19 = vmul.f32 %v1665_v53, %v125_v13 }
  0xc6   :  { %v1342_v15 = vpop.eup %1341  ;;  %1345 = vtanh.f32 %v503_v12  ;;  %v155_v62 = vpop.permute.xlu0 %154 }
  0xc7   :  { %v561_v16 = vpack.c.bf16 %v1342_v15, %v1340_v14  ;;  %v1344_v24 = vpop.eup %1343  ;;  %v244_v3 = vmul.f32 %v1665_v53, %v155_v62 }
  0xc9   :  { %1220 = vmatprep.mubr.msk.bf16.mxu0 %vm595_vm0, %v561_v16  ;;  %v340_v17 = vpop.permute.xlu1 %339  ;;  %v472_v5 = vadd.f32 %v440_v0, %v244_v3 }
  0xca   :  { %v434_v20 = vmul.f32 %v1663_v52, %v340_v17  ;;  %v170_v17 = vpop.permute.xlu0 %169 }
  0xcb   :  { %v510_v10 = vadd.f32 %v1679_v1, %v472_v5 }
  0xcc   :  { %v466_v22 = vadd.f32 %v434_v20, %v238_v19 }
  0xcd   :  { %v344_v23 = vpop.permute.xlu1 %343 }
  0xce   :  { %v435_v25 = vmul.f32 %v1663_v52, %v344_v23  ;;  %v504_v27 = vadd.f32 %v1679_v1, %v466_v22  ;;  %v247_v22 = vmul.f32 %v1665_v53, %v170_v17 }
  0xd0   :  { %v1346_v28 = vpop.eup %1345  ;;  %v467_v30 = vadd.f32 %v435_v25, %v239_v21  ;;  %1347 = vtanh.f32 %v504_v27 }
  0xd1   :  { %v562_v33 = vpack.c.bf16 %v1346_v28, %v1344_v24  ;;  %v175_v28 = vpop.permute.xlu0 %174 }
  0xd2   :  { %v505_v34 = vadd.f32 %v1679_v1, %v467_v30  ;;  %v140_v37 = vpop.permute.xlu1 %139  ;;  %v444_v30 = vmul.f32 %v1663_v52, %v1652_v45  ;;  %v248_v31 = vmul.f32 %v1665_v53, %v175_v28 }
  0xd3   :  { %1221 = vmatmul.mubr.msk.bf16.gmra.mrb[8].mxu0 %vm595_vm0, %v562_v33  ;;  %v241_v40 = vmul.f32 %v1665_v53, %v140_v37 }
  0xd4   :  { %1349 = vtanh.f32 %v505_v34  ;;  %v476_v37 = vadd.f32 %v444_v30, %v248_v31 }
  0xd5   :  { %1351 = vtanh.f32 %v506_v26 }
  0xd7   :  { %v352_v35 = vpop.permute.xlu1 %351 }
  0xd8   :  { %v437_v41 = vmul.f32 %v1663_v52, %v352_v35 }
  0xda   :  { %v469_v43 = vadd.f32 %v437_v41, %v241_v40  ;;  %v1348_v46 = vpop.eup %1347  ;;  %v514_v41 = vadd.f32 %v1679_v1, %v476_v37 }
  0xdc   :  { %v507_v39 = vadd.f32 %v1679_v1, %v469_v43  ;;  %v145_v44 = vpop.permute.xlu1 %144 }
  0xdd   :  { %v242_v54 = vmul.f32 %v1665_v53, %v145_v44 }
  0xde   :  { %v1350_v47 = vpop.eup %1349  ;;  %1353 = vtanh.f32 %v507_v39 }
  0xdf   :  { %v563_v48 = vpack.c.bf16 %v1350_v47, %v1348_v46  ;;  %v1352_v59 = vpop.eup %1351  ;;  %v190_v47 = vpop.permute.xlu0 %189 }
  0xe1   :  { %1224 = vmatprep.mubr.msk.bf16.mxu0 %vm595_vm0, %v563_v48  ;;  %v356_v49 = vpop.permute.xlu1 %355 }
  0xe2   :  { %v438_v55 = vmul.f32 %v1663_v52, %v356_v49 }
  0xe4   :  { %v470_v56 = vadd.f32 %v438_v55, %v242_v54 }
  0xe5   :  { %v360_v57 = vpop.permute.xlu1 %359 }
  0xe6   :  { %v439_v58 = vmul.f32 %v1663_v52, %v360_v57  ;;  %v508_v60 = vadd.f32 %v1679_v1, %v470_v56  ;;  %v195_v56 = vpop.permute.xlu0 %194 }
  0xe7   :  { %v252_v0 = vmul.f32 %v1665_v53, %v195_v56 }
  0xe8   :  { %v1354_v61 = vpop.eup %1353  ;;  %v471_v63 = vadd.f32 %v439_v58, %v243_v8  ;;  %1355 = vtanh.f32 %v508_v60  ;;  %v251_v8 = vmul.f32 %v1665_v53, %v190_v47  ;;  %v1321_v60 = vld [vmem:[%s1915_s5] sm:$0xff]  }
  0xe9   :  { %v564_v4 = vpack.c.bf16 %v1354_v61, %v1352_v59  ;;  %1244 = vmatprep.subr.bf16.mxu1 %v1321_v60 }
  0xea   :  { %v509_v2 = vadd.f32 %v1679_v1, %v471_v63  ;;  %v160_v36 = vpop.permute.xlu1 %159  ;;  %v448_v63 = vmul.f32 %v1663_v52, %v1660_v51  ;;  %1245 = vmatpush3.bf16.msra.mxu1 %v1321_v60 }
  0xeb   :  { %1225 = vmatmul.mubr.msk.bf16.gmra.mrb[12].mxu0 %vm595_vm0, %v564_v4  ;;  %v245_v7 = vmul.f32 %v1665_v53, %v160_v36  ;;  %v1322_v36 = vld [vmem:[%s1915_s5 + $0x8] sm:$0xff]  }
  0xec   :  { %1357 = vtanh.f32 %v509_v2  ;;  %v480_v5 = vadd.f32 %v448_v63, %v252_v0  ;;  %1246 = vmatprep.subr.bf16.mxu1 %v1322_v36 }
  0xed   :  { %1359 = vtanh.f32 %v510_v10  ;;  %v210_v10 = vpop.permute.xlu0 %209 }
  0xee   :  { %1247 = vmatpush3.bf16.msra.mxu1 %v1322_v36 }
  0xef   :  { %v368_v6 = vpop.permute.xlu1 %367 }
  0xf0   :  { %v441_v9 = vmul.f32 %v1663_v52, %v368_v6 }
  0xf2   :  { %v473_v11 = vadd.f32 %v441_v9, %v245_v7  ;;  %v1356_v13 = vpop.eup %1355  ;;  %v518_v9 = vadd.f32 %v1679_v1, %v480_v5 }
  0xf4   :  { %v511_v42 = vadd.f32 %v1679_v1, %v473_v11  ;;  %v165_v12 = vpop.permute.xlu1 %164 }
  0xf5   :  { %v246_v18 = vmul.f32 %v1665_v53, %v165_v12 }
  0xf6   :  { %v1358_v14 = vpop.eup %1357  ;;  %1361 = vtanh.f32 %v511_v42 }
  0xf7   :  { %v565_v15 = vpack.c.bf16 %v1358_v14, %v1356_v13  ;;  %v1360_v24 = vpop.eup %1359 }
  0xf9   :  { %1228 = vmatprep.mubr.msk.bf16.mxu0 %vm595_vm0, %v565_v15  ;;  %v372_v16 = vpop.permute.xlu1 %371 }
  0xfa   :  { %v442_v19 = vmul.f32 %v1663_v52, %v372_v16  ;;  %v215_v16 = vpop.permute.xlu0 %214 }
  0xfb   :  { %v256_v30 = vmul.f32 %v1665_v53, %v215_v16 }
  0xfc   :  { %v474_v20 = vadd.f32 %v442_v19, %v246_v18 }
  0xfd   :  { %v376_v21 = vpop.permute.xlu1 %375 }
  0xfe   :  { %v443_v23 = vmul.f32 %v1663_v52, %v376_v21  ;;  %v512_v25 = vadd.f32 %v1679_v1, %v474_v20 }
 0x100   :  { %v1362_v27 = vpop.eup %1361  ;;  %v475_v29 = vadd.f32 %v443_v23, %v247_v22  ;;  %1363 = vtanh.f32 %v512_v25  ;;  %v255_v22 = vmul.f32 %v1665_v53, %v210_v10  ;;  %v412_v23 = vpop.permute.xlu0 %411 }
 0x101   :  { %v566_v32 = vpack.c.bf16 %v1362_v27, %v1360_v24  ;;  %v452_v31 = vmul.f32 %v1663_v52, %v412_v23 }
 0x102   :  { %v513_v33 = vadd.f32 %v1679_v1, %v475_v29  ;;  %v180_v34 = vpop.permute.xlu1 %179 }
 0x103   :  { %1229 = vmatmul.mubr.msk.bf16.gmra.mrb[16].mxu0 %vm595_vm0, %v566_v32  ;;  %v249_v35 = vmul.f32 %v1665_v53, %v180_v34  ;;  %v484_v37 = vadd.f32 %v452_v31, %v256_v30 }
 0x104   :  { %1365 = vtanh.f32 %v513_v33 }
 0x105   :  { %1367 = vtanh.f32 %v514_v41  ;;  %v522_v41 = vadd.f32 %v1679_v1, %v484_v37 }
 0x107   :  { %v384_v38 = vpop.permute.xlu1 %383 }
 0x108   :  { %v445_v40 = vmul.f32 %v1663_v52, %v384_v38 }
 0x10a   :  { %v477_v26 = vadd.f32 %v445_v40, %v249_v35  ;;  %v1364_v39 = vpop.eup %1363 }
 0x10c   :  { %v515_v45 = vadd.f32 %v1679_v1, %v477_v26  ;;  %v185_v43 = vpop.permute.xlu1 %184 }
 0x10d   :  { %v250_v49 = vmul.f32 %v1665_v53, %v185_v43 }
 0x10e   :  { %v1366_v44 = vpop.eup %1365  ;;  %1369 = vtanh.f32 %v515_v45 }
 0x10f   :  { %v567_v46 = vpack.c.bf16 %v1366_v44, %v1364_v39  ;;  %v1368_v58 = vpop.eup %1367 }
 0x111   :  { %1232 = vmatprep.mubr.msk.bf16.mxu0 %vm595_vm0, %v567_v46  ;;  %v388_v48 = vpop.permute.xlu1 %387 }
 0x112   :  { %v446_v50 = vmul.f32 %v1663_v52, %v388_v48 }
 0x114   :  { %v478_v54 = vadd.f32 %v446_v50, %v250_v49 }
 0x115   :  { %v392_v55 = vpop.permute.xlu1 %391 }
 0x116   :  { %v447_v57 = vmul.f32 %v1663_v52, %v392_v55  ;;  %v516_v59 = vadd.f32 %v1679_v1, %v478_v54 }
 0x118   :  { %v1370_v61 = vpop.eup %1369  ;;  %v479_v62 = vadd.f32 %v447_v57, %v251_v8  ;;  %1371 = vtanh.f32 %v516_v59 }
 0x119   :  { %v568_v3 = vpack.c.bf16 %v1370_v61, %v1368_v58 }
 0x11a   :  { %v517_v4 = vadd.f32 %v1679_v1, %v479_v62  ;;  %v200_v2 = vpop.permute.xlu1 %199 }
 0x11b   :  { %1233 = vmatmul.mubr.msk.bf16.gmra.mrb[20].mxu0 %vm595_vm0, %v568_v3  ;;  %v253_v6 = vmul.f32 %v1665_v53, %v200_v2 }
 0x11c   :  { %1373 = vtanh.f32 %v517_v4 }
 0x11d   :  { %1375 = vtanh.f32 %v518_v9 }
 0x11f   :  { %v400_v51 = vpop.permute.xlu1 %399 }
 0x120   :  { %v449_v7 = vmul.f32 %v1663_v52, %v400_v51 }
 0x122   :  { %v481_v11 = vadd.f32 %v449_v7, %v253_v6  ;;  %v1372_v13 = vpop.eup %1371 }
 0x124   :  { %v519_v42 = vadd.f32 %v1679_v1, %v481_v11  ;;  %v205_v12 = vpop.permute.xlu1 %204 }
 0x125   :  { %v254_v18 = vmul.f32 %v1665_v53, %v205_v12 }
 0x126   :  { %v1374_v14 = vpop.eup %1373  ;;  %1377 = vtanh.f32 %v519_v42 }
 0x127   :  { %v569_v15 = vpack.c.bf16 %v1374_v14, %v1372_v13  ;;  %v1376_v25 = vpop.eup %1375 }
 0x129   :  { %1236 = vmatprep.mubr.msk.bf16.mxu0 %vm595_vm0, %v569_v15  ;;  %v404_v17 = vpop.permute.xlu1 %403 }
 0x12a   :  { %v450_v19 = vmul.f32 %v1663_v52, %v404_v17 }
 0x12c   :  { %v482_v20 = vadd.f32 %v450_v19, %v254_v18 }
 0x12d   :  { %v408_v21 = vpop.permute.xlu1 %407 }
 0x12e   :  { %v451_v24 = vmul.f32 %v1663_v52, %v408_v21  ;;  %v520_v27 = vadd.f32 %v1679_v1, %v482_v20 }
 0x130   :  { %v1378_v28 = vpop.eup %1377  ;;  %v483_v29 = vadd.f32 %v451_v24, %v255_v22  ;;  %1379 = vtanh.f32 %v520_v27 }
 0x131   :  { %v570_v32 = vpack.c.bf16 %v1378_v28, %v1376_v25 }
 0x132   :  { %v521_v33 = vadd.f32 %v1679_v1, %v483_v29  ;;  %v220_v34 = vpop.permute.xlu1 %219 }
 0x133   :  { %1237 = vmatmul.mubr.msk.bf16.gmra.mrb[24].mxu0 %vm595_vm0, %v570_v32  ;;  %v257_v35 = vmul.f32 %v1665_v53, %v220_v34 }
 0x134   :  { %1381 = vtanh.f32 %v521_v33 }
 0x135   :  { %1383 = vtanh.f32 %v522_v41 }
 0x137   :  { %v416_v38 = vpop.permute.xlu1 %415 }
 0x138   :  { %v453_v40 = vmul.f32 %v1663_v52, %v416_v38  ;;  %v1811_v52 = vld [vmem:[%s1914_s4] ss:$0 sm:$0xff] }
 0x13a   :  { %v485_v26 = vadd.f32 %v453_v40, %v257_v35  ;;  %v1380_v43 = vpop.eup %1379 }
 0x13c   :  { %v523_v45 = vadd.f32 %v1679_v1, %v485_v26 }
 0x13e   :  { %v1382_v39 = vpop.eup %1381  ;;  %1385 = vtanh.f32 %v523_v45 }
 0x13f   :  { %v571_v44 = vpack.c.bf16 %v1382_v39, %v1380_v43  ;;  %v1384_v46 = vpop.eup %1383 }
 0x141   :  { %1240 = vmatprep.mubr.msk.bf16.mxu0 %vm595_vm0, %v571_v44 }
 0x148   :  { %v1386_v47 = vpop.eup %1385 }
 0x149   :  { %v572_v48 = vpack.c.bf16 %v1386_v47, %v1384_v46 }
 0x14b   :  { %1241 = vmatmul.mubr.msk.bf16.gmra.mrb[28].mxu0 %vm595_vm0, %v572_v48 }
 0x18d   :  { %v1214_v53 = vpop.f32.mrb[0].mxu0 }
 0x18e   :  { %v687_v1 = vadd.f32 %v1214_v53, %v1811_v52  ;;  %v678_v49 = vpop.f32.mrb[1].mxu0 }
 0x18f   :  { %v679_v50 = vadd.f32 %v1811_v52, %v678_v49  ;;  %v1215_v54 = vpop.f32.mrb[2].mxu0 }
 0x190   :  { %1387 = vtanh.f32 %v687_v1  ;;  %v690_v55 = vadd.f32 %v1215_v54, %v1811_v52  ;;  %v681_v8 = vpop.f32.mrb[3].mxu0 }
 0x191   :  { %1389 = vtanh.f32 %v679_v50  ;;  %v682_v56 = vadd.f32 %v1811_v52, %v681_v8 }
 0x192   :  { %1391 = vtanh.f32 %v690_v55 }
 0x193   :  { %1393 = vtanh.f32 %v682_v56 }
 0x195   :  { %v1218_v57 = vpop.f32.mrb[4].mxu0 }
 0x196   :  { %v703_v58 = vadd.f32 %v1218_v57, %v1811_v52  ;;  %v694_v59 = vpop.f32.mrb[5].mxu0 }
 0x197   :  { %v695_v60 = vadd.f32 %v1811_v52, %v694_v59  ;;  %v1219_v61 = vpop.f32.mrb[6].mxu0 }
 0x198   :  { %1395 = vtanh.f32 %v703_v58  ;;  %v706_v62 = vadd.f32 %v1219_v61, %v1811_v52  ;;  %v697_v63 = vpop.f32.mrb[7].mxu0 }
 0x199   :  { %1397 = vtanh.f32 %v695_v60  ;;  %v698_v0 = vadd.f32 %v1811_v52, %v697_v63 }
 0x19a   :  { %v1388_v3 = vpop.eup %1387  ;;  %1399 = vtanh.f32 %v706_v62 }
 0x19b   :  { %v1390_v4 = vpop.eup %1389  ;;  %1401 = vtanh.f32 %v698_v0 }
 0x19c   :  { %v1392_v2 = vpop.eup %1391 }
 0x19d   :  { %v1394_v36 = vpop.eup %1393  ;;  %v839_v5 = vpack.c.bf16 %v1392_v2, %v1388_v3 }
 0x19e   :  { %v838_v51 = vpack.c.bf16 %v1394_v36, %v1390_v4 }
 0x1a0   :  { %1248 = vmatprep.mubr.msk.bf16.mxu1 %vm595_vm0, %v838_v51 }
 0x1a1   :  { %1249 = vmatmul.mubr.msk.bf16.vlgmr.msra.gmra.mrb[0].mxu1 %vm595_vm0, %v839_v5 }
 0x1a2   :  { %v1396_v6 = vpop.eup %1395 }
 0x1a3   :  { %v1398_v7 = vpop.eup %1397 }
 0x1a4   :  { %v1400_v9 = vpop.eup %1399 }
 0x1a5   :  { %v1402_v10 = vpop.eup %1401  ;;  %v841_v11 = vpack.c.bf16 %v1400_v9, %v1396_v6 }
 0x1a6   :  { %v1222_v42 = vpop.f32.mrb[8].mxu0  ;;  %v840_v12 = vpack.c.bf16 %v1402_v10, %v1398_v7 }
 0x1a7   :  { %v719_v13 = vadd.f32 %v1222_v42, %v1811_v52  ;;  %v710_v14 = vpop.f32.mrb[9].mxu0 }
 0x1a8   :  { %v711_v15 = vadd.f32 %v1811_v52, %v710_v14  ;;  %v1223_v16 = vpop.f32.mrb[10].mxu0  ;;  %1252 = vmatprep.mubr.msk.bf16.mxu1 %vm595_vm0, %v840_v12 }
 0x1a9   :  { %1403 = vtanh.f32 %v719_v13  ;;  %v722_v17 = vadd.f32 %v1223_v16, %v1811_v52  ;;  %v713_v18 = vpop.f32.mrb[11].mxu0  ;;  %1253 = vmatmul.mubr.msk.bf16.gmra.mrb[4].mxu1 %vm595_vm0, %v841_v11 }
 0x1aa   :  { %1405 = vtanh.f32 %v711_v15  ;;  %v714_v19 = vadd.f32 %v1811_v52, %v713_v18 }
 0x1ab   :  { %1407 = vtanh.f32 %v722_v17 }
 0x1ac   :  { %1409 = vtanh.f32 %v714_v19 }
 0x1b3   :  { %v1404_v20 = vpop.eup %1403 }
 0x1b4   :  { %v1406_v21 = vpop.eup %1405 }
 0x1b5   :  { %v1408_v22 = vpop.eup %1407 }
 0x1b6   :  { %v1410_v23 = vpop.eup %1409  ;;  %v843_v24 = vpack.c.bf16 %v1408_v22, %v1404_v20 }
 0x1b7   :  { %v842_v25 = vpack.c.bf16 %v1410_v23, %v1406_v21 }
 0x1b9   :  { %1256 = vmatprep.mubr.msk.bf16.mxu1 %vm595_vm0, %v842_v25 }
 0x1ba   :  { %1257 = vmatmul.mubr.msk.bf16.gmra.mrb[8].mxu1 %vm595_vm0, %v843_v24 }
 0x1be   :  { %v1226_v27 = vpop.f32.mrb[12].mxu0 }
 0x1bf   :  { %v735_v28 = vadd.f32 %v1226_v27, %v1811_v52  ;;  %v726_v29 = vpop.f32.mrb[13].mxu0 }
 0x1c0   :  { %v727_v30 = vadd.f32 %v1811_v52, %v726_v29  ;;  %v1227_v31 = vpop.f32.mrb[14].mxu0 }
 0x1c1   :  { %1411 = vtanh.f32 %v735_v28  ;;  %v738_v32 = vadd.f32 %v1227_v31, %v1811_v52  ;;  %v729_v33 = vpop.f32.mrb[15].mxu0 }
 0x1c2   :  { %1413 = vtanh.f32 %v727_v30  ;;  %v730_v34 = vadd.f32 %v1811_v52, %v729_v33 }
 0x1c3   :  { %1415 = vtanh.f32 %v738_v32 }
 0x1c4   :  { %1417 = vtanh.f32 %v730_v34  ;;  %v1864_v34 = vld [vmem:[%s1916_s6] ss:$0 sm:$0xff]  ;;  %s1477_s6 = smov [#allocation2]  }
 0x1c5   :  { %s1122_s28 = sshll.u32 %s1477_s6, 4  ;;  %s1123_s28 = int_to_ptr.vmem [resolvable:$true] %s1122_s28 }
 0x1c6   :  { %s1451_s29 = scalar_lea.vmem %s1123_s28, 4096  ;;  %p1456_p1 = scmp.lt.s32.totalorder %s1123_s28, %s1123_s28 }
 0x1c7   :  { %p1452_p0 = scmp.ne.s32.totalorder %s1123_s28, %s1451_s29  ;;  %p1457_p2 = scmp.lt.s32.totalorder %s1451_s29, %s1451_s29 }
 0x1c9   :  { %p1458_p3 = por %p1457_p2, %p1456_p1 }
 0x1cb   :  { %v1412_v37 = vpop.eup %1411  ;;  %p1459_p4 = pnand %p1458_p3, %p1452_p0 }
 0x1cc   :  { %v1414_v38 = vpop.eup %1413 }
 0x1cd   :  { %v1416_v35 = vpop.eup %1415 }
 0x1ce   :  { %v1418_v40 = vpop.eup %1417  ;;  %v845_v41 = vpack.c.bf16 %v1416_v35, %v1412_v37 }
 0x1cf   :  { %v844_v26 = vpack.c.bf16 %v1418_v40, %v1414_v38 }
 0x1d1   :  { %1260 = vmatprep.mubr.msk.bf16.mxu1 %vm595_vm0, %v844_v26 }
 0x1d2   :  { %1261 = vmatmul.mubr.msk.bf16.gmra.mrb[12].mxu1 %vm595_vm0, %v845_v41 }
 0x1d6   :  { %v1230_v45 = vpop.f32.mrb[16].mxu0 }
 0x1d7   :  { %v751_v43 = vadd.f32 %v1230_v45, %v1811_v52  ;;  %v742_v39 = vpop.f32.mrb[17].mxu0 }
 0x1d8   :  { %v743_v44 = vadd.f32 %v1811_v52, %v742_v39  ;;  %v1231_v46 = vpop.f32.mrb[18].mxu0 }
 0x1d9   :  { %1419 = vtanh.f32 %v751_v43  ;;  %v754_v47 = vadd.f32 %v1231_v46, %v1811_v52  ;;  %v745_v48 = vpop.f32.mrb[19].mxu0 }
 0x1da   :  { %1421 = vtanh.f32 %v743_v44  ;;  %v746_v53 = vadd.f32 %v1811_v52, %v745_v48 }
 0x1db   :  { %1423 = vtanh.f32 %v754_v47 }
 0x1dc   :  { %1425 = vtanh.f32 %v746_v53 }
 0x1e3   :  { %v1420_v1 = vpop.eup %1419 }
 0x1e4   :  { %v1422_v49 = vpop.eup %1421 }
 0x1e5   :  { %v1424_v50 = vpop.eup %1423 }
 0x1e6   :  { %v1426_v54 = vpop.eup %1425  ;;  %v847_v55 = vpack.c.bf16 %v1424_v50, %v1420_v1 }
 0x1e7   :  { %v846_v8 = vpack.c.bf16 %v1426_v54, %v1422_v49 }
 0x1e9   :  { %1264 = vmatprep.mubr.msk.bf16.mxu1 %vm595_vm0, %v846_v8 }
 0x1ea   :  { %1265 = vmatmul.mubr.msk.bf16.gmra.mrb[16].mxu1 %vm595_vm0, %v847_v55 }
 0x1ee   :  { %v1234_v56 = vpop.f32.mrb[20].mxu0 }
 0x1ef   :  { %v767_v57 = vadd.f32 %v1234_v56, %v1811_v52  ;;  %v758_v58 = vpop.f32.mrb[21].mxu0 }
 0x1f0   :  { %v759_v59 = vadd.f32 %v1811_v52, %v758_v58  ;;  %v1235_v60 = vpop.f32.mrb[22].mxu0 }
 0x1f1   :  { %1427 = vtanh.f32 %v767_v57  ;;  %v770_v61 = vadd.f32 %v1235_v60, %v1811_v52  ;;  %v761_v62 = vpop.f32.mrb[23].mxu0 }
 0x1f2   :  { %1429 = vtanh.f32 %v759_v59  ;;  %v762_v63 = vadd.f32 %v1811_v52, %v761_v62 }
 0x1f3   :  { %1431 = vtanh.f32 %v770_v61 }
 0x1f4   :  { %1433 = vtanh.f32 %v762_v63 }
 0x1fb   :  { %v1428_v0 = vpop.eup %1427 }
 0x1fc   :  { %v1430_v3 = vpop.eup %1429 }
 0x1fd   :  { %v1432_v4 = vpop.eup %1431 }
 0x1fe   :  { %v1434_v2 = vpop.eup %1433  ;;  %v849_v36 = vpack.c.bf16 %v1432_v4, %v1428_v0 }
 0x1ff   :  { %v848_v5 = vpack.c.bf16 %v1434_v2, %v1430_v3 }
 0x201   :  { %1268 = vmatprep.mubr.msk.bf16.mxu1 %vm595_vm0, %v848_v5 }
 0x202   :  { %1269 = vmatmul.mubr.msk.bf16.gmra.mrb[20].mxu1 %vm595_vm0, %v849_v36 }
 0x206   :  { %v1238_v51 = vpop.f32.mrb[24].mxu0 }
 0x207   :  { %v783_v6 = vadd.f32 %v1238_v51, %v1811_v52  ;;  %v774_v7 = vpop.f32.mrb[25].mxu0 }
 0x208   :  { %v775_v9 = vadd.f32 %v1811_v52, %v774_v7  ;;  %v1239_v10 = vpop.f32.mrb[26].mxu0 }
 0x209   :  { %1435 = vtanh.f32 %v783_v6  ;;  %v786_v11 = vadd.f32 %v1239_v10, %v1811_v52  ;;  %v777_v42 = vpop.f32.mrb[27].mxu0 }
 0x20a   :  { %1437 = vtanh.f32 %v775_v9  ;;  %v778_v12 = vadd.f32 %v1811_v52, %v777_v42 }
 0x20b   :  { %1439 = vtanh.f32 %v786_v11 }
 0x20c   :  { %1441 = vtanh.f32 %v778_v12 }
 0x213   :  { %v1436_v13 = vpop.eup %1435 }
 0x214   :  { %v1438_v14 = vpop.eup %1437 }
 0x215   :  { %v1440_v15 = vpop.eup %1439 }
 0x216   :  { %v1442_v16 = vpop.eup %1441  ;;  %v851_v17 = vpack.c.bf16 %v1440_v15, %v1436_v13 }
 0x217   :  { %v850_v18 = vpack.c.bf16 %v1442_v16, %v1438_v14 }
 0x219   :  { %1272 = vmatprep.mubr.msk.bf16.mxu1 %vm595_vm0, %v850_v18 }
 0x21a   :  { %1273 = vmatmul.mubr.msk.bf16.gmra.mrb[24].mxu1 %vm595_vm0, %v851_v17 }
 0x21e   :  { %v1242_v19 = vpop.f32.mrb[28].mxu0 }
 0x21f   :  { %v799_v20 = vadd.f32 %v1242_v19, %v1811_v52  ;;  %v790_v21 = vpop.f32.mrb[29].mxu0 }
 0x220   :  { %v791_v22 = vadd.f32 %v1811_v52, %v790_v21  ;;  %v1243_v23 = vpop.f32.mrb[30].mxu0 }
 0x221   :  { %1443 = vtanh.f32 %v799_v20  ;;  %v802_v24 = vadd.f32 %v1243_v23, %v1811_v52  ;;  %v793_v25 = vpop.f32.mrb[31].mxu0 }
 0x222   :  { %1445 = vtanh.f32 %v791_v22  ;;  %v794_v27 = vadd.f32 %v1811_v52, %v793_v25 }
 0x223   :  { %1447 = vtanh.f32 %v802_v24 }
 0x224   :  { %1449 = vtanh.f32 %v794_v27 }
 0x22b   :  { %v1444_v28 = vpop.eup %1443 }
 0x22c   :  { %v1446_v29 = vpop.eup %1445 }
 0x22d   :  { %v1448_v30 = vpop.eup %1447 }
 0x22e   :  { %v1450_v31 = vpop.eup %1449  ;;  %v853_v32 = vpack.c.bf16 %v1448_v30, %v1444_v28 }
 0x22f   :  { %v852_v33 = vpack.c.bf16 %v1450_v31, %v1446_v29 }
 0x231   :  { %1276 = vmatprep.mubr.msk.bf16.mxu1 %vm595_vm0, %v852_v33 }
 0x232   :  { %1277 = vmatmul.mubr.msk.bf16.gmra.mrb[28].mxu1 %vm595_vm0, %v853_v32 }
 0x274   :  { %v1250_v37 = vpop.f32.mrb[0].mxu1 }
 0x275   :  { %v967_v52 = vadd.f32 %v1250_v37, %v1864_v34  ;;  %v958_v38 = vpop.f32.mrb[1].mxu1 }
 0x276   :  { %v959_v35 = vadd.f32 %v1864_v34, %v958_v38  ;;  %v1251_v40 = vpop.f32.mrb[2].mxu1 }
 0x277   :  { %1087 = vst [vmem:[#allocation2 + $0x10] sm:$0xff] %v967_v52  ;;  %v970_v41 = vadd.f32 %v1251_v40, %v1864_v34  ;;  %v961_v26 = vpop.f32.mrb[3].mxu1 }
 0x278   :  { %1085 = vst [vmem:[#allocation2] sm:$0xff] %v959_v35  ;;  %v962_v45 = vadd.f32 %v1864_v34, %v961_v26 }
 0x279   :  { %1088 = vst [vmem:[#allocation2 + $0x18] sm:$0xff] %v970_v41 }
 0x27a   :  { %1086 = vst [vmem:[#allocation2 + $0x8] sm:$0xff] %v962_v45 }
 0x27c   :  { %v1254_v43 = vpop.f32.mrb[4].mxu1 }
 0x27d   :  { %v983_v39 = vadd.f32 %v1254_v43, %v1864_v34  ;;  %v974_v44 = vpop.f32.mrb[5].mxu1 }
 0x27e   :  { %v975_v46 = vadd.f32 %v1864_v34, %v974_v44  ;;  %v1255_v47 = vpop.f32.mrb[6].mxu1 }
 0x27f   :  { %1091 = vst [vmem:[#allocation2 + $0x30] sm:$0xff] %v983_v39  ;;  %v986_v48 = vadd.f32 %v1255_v47, %v1864_v34  ;;  %v977_v53 = vpop.f32.mrb[7].mxu1 }
 0x280   :  { %1089 = vst [vmem:[#allocation2 + $0x20] sm:$0xff] %v975_v46  ;;  %v978_v1 = vadd.f32 %v1864_v34, %v977_v53 }
 0x281   :  { %1092 = vst [vmem:[#allocation2 + $0x38] sm:$0xff] %v986_v48 }
 0x282   :  { %1090 = vst [vmem:[#allocation2 + $0x28] sm:$0xff] %v978_v1 }
 0x28d   :  { %v1258_v49 = vpop.f32.mrb[8].mxu1 }
 0x28e   :  { %v999_v50 = vadd.f32 %v1258_v49, %v1864_v34  ;;  %v990_v54 = vpop.f32.mrb[9].mxu1 }
 0x28f   :  { %v991_v55 = vadd.f32 %v1864_v34, %v990_v54  ;;  %v1259_v8 = vpop.f32.mrb[10].mxu1 }
 0x290   :  { %1095 = vst [vmem:[#allocation2 + $0x50] sm:$0xff] %v999_v50  ;;  %v1002_v56 = vadd.f32 %v1259_v8, %v1864_v34  ;;  %v993_v57 = vpop.f32.mrb[11].mxu1 }
 0x291   :  { %1093 = vst [vmem:[#allocation2 + $0x40] sm:$0xff] %v991_v55  ;;  %v994_v58 = vadd.f32 %v1864_v34, %v993_v57 }
 0x292   :  { %1096 = vst [vmem:[#allocation2 + $0x58] sm:$0xff] %v1002_v56 }
 0x293   :  { %1094 = vst [vmem:[#allocation2 + $0x48] sm:$0xff] %v994_v58 }
 0x2a5   :  { %v1262_v59 = vpop.f32.mrb[12].mxu1 }
 0x2a6   :  { %v1015_v60 = vadd.f32 %v1262_v59, %v1864_v34  ;;  %v1006_v61 = vpop.f32.mrb[13].mxu1 }
 0x2a7   :  { %v1007_v62 = vadd.f32 %v1864_v34, %v1006_v61  ;;  %v1263_v63 = vpop.f32.mrb[14].mxu1 }
 0x2a8   :  { %1099 = vst [vmem:[#allocation2 + $0x70] sm:$0xff] %v1015_v60  ;;  %v1018_v0 = vadd.f32 %v1263_v63, %v1864_v34  ;;  %v1009_v3 = vpop.f32.mrb[15].mxu1 }
 0x2a9   :  { %1097 = vst [vmem:[#allocation2 + $0x60] sm:$0xff] %v1007_v62  ;;  %v1010_v4 = vadd.f32 %v1864_v34, %v1009_v3 }
 0x2aa   :  { %1100 = vst [vmem:[#allocation2 + $0x78] sm:$0xff] %v1018_v0 }
 0x2ab   :  { %1098 = vst [vmem:[#allocation2 + $0x68] sm:$0xff] %v1010_v4 }
 0x2bd   :  { %v1266_v2 = vpop.f32.mrb[16].mxu1 }
 0x2be   :  { %v1031_v36 = vadd.f32 %v1266_v2, %v1864_v34  ;;  %v1022_v5 = vpop.f32.mrb[17].mxu1 }
 0x2bf   :  { %v1023_v51 = vadd.f32 %v1864_v34, %v1022_v5  ;;  %v1267_v6 = vpop.f32.mrb[18].mxu1 }
 0x2c0   :  { %1103 = vst [vmem:[#allocation2 + $0x90] sm:$0xff] %v1031_v36  ;;  %v1034_v7 = vadd.f32 %v1267_v6, %v1864_v34  ;;  %v1025_v9 = vpop.f32.mrb[19].mxu1 }
 0x2c1   :  { %1101 = vst [vmem:[#allocation2 + $0x80] sm:$0xff] %v1023_v51  ;;  %v1026_v10 = vadd.f32 %v1864_v34, %v1025_v9 }
 0x2c2   :  { %1104 = vst [vmem:[#allocation2 + $0x98] sm:$0xff] %v1034_v7 }
 0x2c3   :  { %1102 = vst [vmem:[#allocation2 + $0x88] sm:$0xff] %v1026_v10 }
 0x2d5   :  { %v1270_v11 = vpop.f32.mrb[20].mxu1 }
 0x2d6   :  { %v1047_v42 = vadd.f32 %v1270_v11, %v1864_v34  ;;  %v1038_v12 = vpop.f32.mrb[21].mxu1 }
 0x2d7   :  { %v1039_v13 = vadd.f32 %v1864_v34, %v1038_v12  ;;  %v1271_v14 = vpop.f32.mrb[22].mxu1 }
 0x2d8   :  { %1107 = vst [vmem:[#allocation2 + $0xb0] sm:$0xff] %v1047_v42  ;;  %v1050_v15 = vadd.f32 %v1271_v14, %v1864_v34  ;;  %v1041_v16 = vpop.f32.mrb[23].mxu1 }
 0x2d9   :  { %1105 = vst [vmem:[#allocation2 + $0xa0] sm:$0xff] %v1039_v13  ;;  %v1042_v17 = vadd.f32 %v1864_v34, %v1041_v16 }
 0x2da   :  { %1108 = vst [vmem:[#allocation2 + $0xb8] sm:$0xff] %v1050_v15 }
 0x2db   :  { %1106 = vst [vmem:[#allocation2 + $0xa8] sm:$0xff] %v1042_v17 }
 0x2ed   :  { %v1274_v18 = vpop.f32.mrb[24].mxu1 }
 0x2ee   :  { %v1063_v19 = vadd.f32 %v1274_v18, %v1864_v34  ;;  %v1054_v20 = vpop.f32.mrb[25].mxu1 }
 0x2ef   :  { %v1055_v21 = vadd.f32 %v1864_v34, %v1054_v20  ;;  %v1275_v22 = vpop.f32.mrb[26].mxu1 }
 0x2f0   :  { %1111 = vst [vmem:[#allocation2 + $0xd0] sm:$0xff] %v1063_v19  ;;  %v1066_v23 = vadd.f32 %v1275_v22, %v1864_v34  ;;  %v1057_v24 = vpop.f32.mrb[27].mxu1 }
 0x2f1   :  { %1109 = vst [vmem:[#allocation2 + $0xc0] sm:$0xff] %v1055_v21  ;;  %v1058_v25 = vadd.f32 %v1864_v34, %v1057_v24 }
 0x2f2   :  { %1112 = vst [vmem:[#allocation2 + $0xd8] sm:$0xff] %v1066_v23 }
 0x2f3   :  { %1110 = vst [vmem:[#allocation2 + $0xc8] sm:$0xff] %v1058_v25 }
 0x305   :  { %v1278_v27 = vpop.f32.mrb[28].mxu1 }
 0x306   :  { %v1079_v28 = vadd.f32 %v1278_v27, %v1864_v34  ;;  %v1070_v29 = vpop.f32.mrb[29].mxu1 }
 0x307   :  { %v1071_v30 = vadd.f32 %v1864_v34, %v1070_v29  ;;  %v1279_v31 = vpop.f32.mrb[30].mxu1 }
 0x308   :  { %1115 = vst [vmem:[#allocation2 + $0xf0] sm:$0xff] %v1079_v28  ;;  %v1082_v32 = vadd.f32 %v1279_v31, %v1864_v34  ;;  %v1073_v33 = vpop.f32.mrb[31].mxu1 }
 0x309   :  { %1113 = vst [vmem:[#allocation2 + $0xe0] sm:$0xff] %v1071_v30  ;;  %v1074_v37 = vadd.f32 %v1864_v34, %v1073_v33 }
 0x30a   :  { %1116 = vst [vmem:[#allocation2 + $0xf8] sm:$0xff] %v1082_v32 }
 0x30b   :  { %1114 = vst [vmem:[#allocation2 + $0xe8] sm:$0xff] %v1074_v37 }
 0x30c   :  { %1462 = shalt.err (!%p1459_p4)
}
 0x30d   :  { %s1463_s9 = scalar_lea.hbm %s1917_s7, 4096 }
 0x30e   :  { %p1464_p5 = scmp.ne.s32.totalorder %s1917_s7, %s1463_s9  ;;  %p1467_p6 = scmp.lt.u32.totalorder %s1463_s9, %s1917_s7 }
 0x310   :  { %p1469_p7 = pnand %p1467_p6, %p1464_p5 }
 0x312   :  { %1472 = shalt.err (!%p1469_p7)
}
 0x313   :  { %s1478_s14 = smov 128   ;;  %s1479_s15 = smov 8  }
 0x314   :  { %1128 = dma.vmem_to_hbm [thread:$0]  %s1123_s28, 4096, %s1917_s7, [#allocation3], %s1478_s14, %s1478_s14, %s1479_s15  }
 0x315   :  { %1473 = dma.done.wait [#allocation3], 4096  }
 0x316   :  { %1474 = vsyncadd [#allocation3], 4294963200 }
 0x317   :  { %1132 = vsyncpa [#allocation3], 1 }

</bundles_post_ra>
